<compile_context>
chip_gen: v6e
topology: v6e:2x2x1
jax: 0.10.0
libtpu: 0.0.40
codegen_flags: <defaults>
</compile_context>

<pallas_src>
import jax
import jax.numpy as jnp
from jax.experimental import pallas as pl
from jax.experimental.pallas import tpu as pltpu

B, L, CIN, COUT, K, DOUT = 2, 16, 3, 6, 3, 5
LOUT = L - K + 1          # 14 (stride 1, no padding)
LANES = 128               # lane-dense padded output / weight width


def fused_kernel(x_ref, w_ref, b_ref, y_ref):
    """Conv(BLC) + Linear fused: K shifted MXU dots, f32 accumulation.

    x_ref : (B, L, CIN)        VMEM  raw channels-last input
    w_ref : (K, CIN, LANES)    VMEM  conv weight with Linear folded in, lane-padded
    b_ref : (1, LANES)         VMEM  fused bias, lane-padded
    y_ref : (B, LOUT, LANES)   VMEM  lane-dense result; wrapper slices [..., :DOUT]
    """
    x = x_ref[...]            # (B, L, CIN)
    bias = b_ref[...]         # (1, LANES)
    for b in range(B):        # B = 2, static unroll
        acc = jnp.zeros((LOUT, LANES), jnp.float32)
        for k in range(K):    # K = 3, static unroll: shifted matmuls == im2col
            acc = acc + jnp.dot(
                x[b, k:k + LOUT, :],                 # (LOUT, CIN)
                w_ref[k],                            # (CIN, LANES)
                preferred_element_type=jnp.float32)
        y_ref[b] = (acc + bias).astype(y_ref.dtype)


def _prepare_fused_params(wc, bc, wl, bl):
    """One-time weight prep (not on the per-call path)."""
    # Fold Linear into the conv: (K, CIN, COUT) @ (COUT, DOUT) -> (K, CIN, DOUT)
    w_fused = jnp.einsum("kco,od->kcd", wc, wl)
    b_fused = bc @ wl + bl
    # Pad to lane-dense width (single Pad HLO each, executed once).
    w_pad = jnp.pad(w_fused, ((0, 0), (0, 0), (0, LANES - DOUT))).astype(jnp.float32)
    b_pad = jnp.pad(b_fused, (0, LANES - DOUT)).reshape(1, LANES).astype(jnp.float32)
    return w_pad, b_pad


def make_model_forward(wc, bc, wl, bl):
    """Build a jitted forward closing over the pre-fused, pre-padded weights."""
    w_pad, b_pad = _prepare_fused_params(wc, bc, wl, bl)
    w_pad = jax.device_put(w_pad)
    b_pad = jax.device_put(b_pad)

    vmem = pl.BlockSpec(memory_space=pltpu.MemorySpace.VMEM)
    bytes_accessed = (B * L * CIN + K * CIN * LANES + LANES + B * LOUT * LANES) * 4
    call = pl.pallas_call(
        fused_kernel,
        out_shape=jax.ShapeDtypeStruct((B, LOUT, LANES), jnp.float32),
        in_specs=[vmem, vmem, vmem],
        out_specs=vmem,
        cost_estimate=pl.CostEstimate(
            flops=2 * B * LOUT * K * CIN * LANES,
            transcendentals=0,
            bytes_accessed=bytes_accessed,
        ),
    )

    @jax.jit
    def forward(x):
        y_pad = call(x, w_pad, b_pad)      # (B, LOUT, LANES)
        return y_pad[..., :DOUT]           # (B, LOUT, DOUT)

    return forward


def reference_forward(x, wc, bc, wl, bl):
    # Pure-JAX reference: explicit conv (shifted matmuls) + separate Linear.
    h = jnp.zeros((B, LOUT, COUT), jnp.float32)
    for k in range(K):
        h = h + jnp.einsum("blc,cd->bld", x[:, k:k + LOUT, :], wc[k])
    h = h + bc
    return jnp.einsum("bld,de->ble", h, wl) + bl


if __name__ == "__main__":
    key = jax.random.PRNGKey(0)
    kx, kwc, kbc, kwl, kbl = jax.random.split(key, 5)

    # Deterministic synthetic parameters (ConvBLC(3, 6, 3) + Linear(6, 5)).
    x = jax.random.normal(kx, (B, L, CIN), dtype=jnp.float32)
    wc = jax.random.normal(kwc, (K, CIN, COUT), dtype=jnp.float32) * 0.1   # conv weight
    bc = jax.random.normal(kbc, (COUT,), dtype=jnp.float32) * 0.1          # conv bias
    wl = jax.random.normal(kwl, (COUT, DOUT), dtype=jnp.float32) * 0.1     # linear weight (in, out)
    bl = jax.random.normal(kbl, (DOUT,), dtype=jnp.float32) * 0.1          # linear bias

    forward = make_model_forward(wc, bc, wl, bl)   # weight fusion/padding done once here
    y = forward(x)
    y = jax.block_until_ready(y)

    y_ref = reference_forward(x, wc, bc, wl, bl)
    assert y.shape == (B, LOUT, DOUT)
    assert jnp.allclose(y, y_ref, atol=1e-5, rtol=1e-5)

    print("KERNEL_OK")
</pallas_src>

<mosaic_0001>
module attributes {stable_mosaic.version = 11 : i64} {
  func.func @fused_kernel(%arg0: memref<2x16x3xf32, #tpu.memory_space<vmem>>, %arg1: memref<3x3x128xf32, #tpu.memory_space<vmem>>, %arg2: memref<1x128xf32, #tpu.memory_space<vmem>>, %arg3: memref<2x14x128xf32, #tpu.memory_space<vmem>>) attributes {dimension_semantics = [], scalar_prefetch = 0 : i64, scratch_operands = 0 : i64, tpu.core_type = #tpu.core_type<tc>} {
    %c0 = arith.constant 0 : index
    %c0_0 = arith.constant 0 : index
    %c0_1 = arith.constant 0 : index
    %0 = vector.load %arg0[%c0, %c0_0, %c0_1] : memref<2x16x3xf32, #tpu.memory_space<vmem>>, vector<2x16x3xf32>
    %c0_2 = arith.constant 0 : index
    %c0_3 = arith.constant 0 : index
    %1 = vector.load %arg2[%c0_2, %c0_3] : memref<1x128xf32, #tpu.memory_space<vmem>>, vector<1x128xf32>
    %cst = arith.constant 0.000000e+00 : f32
    %2 = vector.broadcast %cst : f32 to vector<14x128xf32>
    %3 = vector.extract_strided_slice %0 {offsets = [0, 0, 0], sizes = [1, 14, 3], strides = [1, 1, 1]} : vector<2x16x3xf32> to vector<1x14x3xf32>
    %4 = vector.shape_cast %3 : vector<1x14x3xf32> to vector<14x3xf32>
    %c0_4 = arith.constant 0 : index
    %c0_5 = arith.constant 0 : index
    %c0_6 = arith.constant 0 : index
    %5 = vector.load %arg1[%c0_4, %c0_5, %c0_6] : memref<3x3x128xf32, #tpu.memory_space<vmem>>, vector<1x3x128xf32>
    %6 = vector.shape_cast %5 : vector<1x3x128xf32> to vector<3x128xf32>
    %cst_7 = arith.constant dense<0.000000e+00> : vector<14x128xf32>
    %7 = tpu.matmul %4, %6, %cst_7 {dimension_numbers = #tpu.dot_dimension_numbers<[1], [0], [0], [1], [0, 0, 1, 1], [], []>} : vector<14x3xf32>, vector<3x128xf32>, vector<14x128xf32> -> vector<14x128xf32>
    %8 = arith.addf %2, %7 : vector<14x128xf32>
    %9 = vector.extract_strided_slice %0 {offsets = [0, 1, 0], sizes = [1, 14, 3], strides = [1, 1, 1]} : vector<2x16x3xf32> to vector<1x14x3xf32>
    %10 = vector.shape_cast %9 : vector<1x14x3xf32> to vector<14x3xf32>
    %c1 = arith.constant 1 : index
    %c0_8 = arith.constant 0 : index
    %c0_9 = arith.constant 0 : index
    %11 = vector.load %arg1[%c1, %c0_8, %c0_9] : memref<3x3x128xf32, #tpu.memory_space<vmem>>, vector<1x3x128xf32>
    %12 = vector.shape_cast %11 : vector<1x3x128xf32> to vector<3x128xf32>
    %cst_10 = arith.constant dense<0.000000e+00> : vector<14x128xf32>
    %13 = tpu.matmul %10, %12, %cst_10 {dimension_numbers = #tpu.dot_dimension_numbers<[1], [0], [0], [1], [0, 0, 1, 1], [], []>} : vector<14x3xf32>, vector<3x128xf32>, vector<14x128xf32> -> vector<14x128xf32>
    %14 = arith.addf %8, %13 : vector<14x128xf32>
    %15 = vector.extract_strided_slice %0 {offsets = [0, 2, 0], sizes = [1, 14, 3], strides = [1, 1, 1]} : vector<2x16x3xf32> to vector<1x14x3xf32>
    %16 = vector.shape_cast %15 : vector<1x14x3xf32> to vector<14x3xf32>
    %c2 = arith.constant 2 : index
    %c0_11 = arith.constant 0 : index
    %c0_12 = arith.constant 0 : index
    %17 = vector.load %arg1[%c2, %c0_11, %c0_12] : memref<3x3x128xf32, #tpu.memory_space<vmem>>, vector<1x3x128xf32>
    %18 = vector.shape_cast %17 : vector<1x3x128xf32> to vector<3x128xf32>
    %cst_13 = arith.constant dense<0.000000e+00> : vector<14x128xf32>
    %19 = tpu.matmul %16, %18, %cst_13 {dimension_numbers = #tpu.dot_dimension_numbers<[1], [0], [0], [1], [0, 0, 1, 1], [], []>} : vector<14x3xf32>, vector<3x128xf32>, vector<14x128xf32> -> vector<14x128xf32>
    %20 = arith.addf %14, %19 : vector<14x128xf32>
    %21 = vector.broadcast %1 : vector<1x128xf32> to vector<14x128xf32>
    %22 = arith.addf %20, %21 : vector<14x128xf32>
    %c0_14 = arith.constant 0 : index
    %c0_15 = arith.constant 0 : index
    %c0_16 = arith.constant 0 : index
    %23 = vector.load %arg3[%c0_14, %c0_15, %c0_16] : memref<2x14x128xf32, #tpu.memory_space<vmem>>, vector<1x14x128xf32>
    %24 = vector.shape_cast %23 : vector<1x14x128xf32> to vector<14x128xf32>
    %25 = vector.shape_cast %22 : vector<14x128xf32> to vector<1x14x128xf32>
    tpu.vector_store %arg3[%c0_14, %c0_15, %c0_16], %25 {strides = array<i32>} : memref<2x14x128xf32, #tpu.memory_space<vmem>>, vector<1x14x128xf32>,
    %cst_17 = arith.constant 0.000000e+00 : f32
    %26 = vector.broadcast %cst_17 : f32 to vector<14x128xf32>
    %27 = vector.extract_strided_slice %0 {offsets = [1, 0, 0], sizes = [1, 14, 3], strides = [1, 1, 1]} : vector<2x16x3xf32> to vector<1x14x3xf32>
    %28 = vector.shape_cast %27 : vector<1x14x3xf32> to vector<14x3xf32>
    %c0_18 = arith.constant 0 : index
    %c0_19 = arith.constant 0 : index
    %c0_20 = arith.constant 0 : index
    %29 = vector.load %arg1[%c0_18, %c0_19, %c0_20] : memref<3x3x128xf32, #tpu.memory_space<vmem>>, vector<1x3x128xf32>
    %30 = vector.shape_cast %29 : vector<1x3x128xf32> to vector<3x128xf32>
    %cst_21 = arith.constant dense<0.000000e+00> : vector<14x128xf32>
    %31 = tpu.matmul %28, %30, %cst_21 {dimension_numbers = #tpu.dot_dimension_numbers<[1], [0], [0], [1], [0, 0, 1, 1], [], []>} : vector<14x3xf32>, vector<3x128xf32>, vector<14x128xf32> -> vector<14x128xf32>
    %32 = arith.addf %26, %31 : vector<14x128xf32>
    %33 = vector.extract_strided_slice %0 {offsets = [1, 1, 0], sizes = [1, 14, 3], strides = [1, 1, 1]} : vector<2x16x3xf32> to vector<1x14x3xf32>
    %34 = vector.shape_cast %33 : vector<1x14x3xf32> to vector<14x3xf32>
    %c1_22 = arith.constant 1 : index
    %c0_23 = arith.constant 0 : index
    %c0_24 = arith.constant 0 : index
    %35 = vector.load %arg1[%c1_22, %c0_23, %c0_24] : memref<3x3x128xf32, #tpu.memory_space<vmem>>, vector<1x3x128xf32>
    %36 = vector.shape_cast %35 : vector<1x3x128xf32> to vector<3x128xf32>
    %cst_25 = arith.constant dense<0.000000e+00> : vector<14x128xf32>
    %37 = tpu.matmul %34, %36, %cst_25 {dimension_numbers = #tpu.dot_dimension_numbers<[1], [0], [0], [1], [0, 0, 1, 1], [], []>} : vector<14x3xf32>, vector<3x128xf32>, vector<14x128xf32> -> vector<14x128xf32>
    %38 = arith.addf %32, %37 : vector<14x128xf32>
    %39 = vector.extract_strided_slice %0 {offsets = [1, 2, 0], sizes = [1, 14, 3], strides = [1, 1, 1]} : vector<2x16x3xf32> to vector<1x14x3xf32>
    %40 = vector.shape_cast %39 : vector<1x14x3xf32> to vector<14x3xf32>
    %c2_26 = arith.constant 2 : index
    %c0_27 = arith.constant 0 : index
    %c0_28 = arith.constant 0 : index
    %41 = vector.load %arg1[%c2_26, %c0_27, %c0_28] : memref<3x3x128xf32, #tpu.memory_space<vmem>>, vector<1x3x128xf32>
    %42 = vector.shape_cast %41 : vector<1x3x128xf32> to vector<3x128xf32>
    %cst_29 = arith.constant dense<0.000000e+00> : vector<14x128xf32>
    %43 = tpu.matmul %40, %42, %cst_29 {dimension_numbers = #tpu.dot_dimension_numbers<[1], [0], [0], [1], [0, 0, 1, 1], [], []>} : vector<14x3xf32>, vector<3x128xf32>, vector<14x128xf32> -> vector<14x128xf32>
    %44 = arith.addf %38, %43 : vector<14x128xf32>
    %45 = vector.broadcast %1 : vector<1x128xf32> to vector<14x128xf32>
    %46 = arith.addf %44, %45 : vector<14x128xf32>
    %c1_30 = arith.constant 1 : index
    %c0_31 = arith.constant 0 : index
    %c0_32 = arith.constant 0 : index
    %47 = vector.load %arg3[%c1_30, %c0_31, %c0_32] : memref<2x14x128xf32, #tpu.memory_space<vmem>>, vector<1x14x128xf32>
    %48 = vector.shape_cast %47 : vector<1x14x128xf32> to vector<14x128xf32>
    %49 = vector.shape_cast %46 : vector<14x128xf32> to vector<1x14x128xf32>
    tpu.vector_store %arg3[%c1_30, %c0_31, %c0_32], %49 {strides = array<i32>} : memref<2x14x128xf32, #tpu.memory_space<vmem>>, vector<1x14x128xf32>,
    return
  }
}

</mosaic_0001>

<bundles_post_ra>
// kernel: forward.1
= control target key start
LH: loop header
LB: loop body
LE: loop exit
PB: predicated region body
PF: predicated region fallthrough
CT: control target
= control target key end

     0   :  { %vm33_vm0 = vcmask 1042432   ;;  %vm24_vm1 = vcmask 1046528   ;;  %vm28_vm2 = vcmask 23552   ;;  %vm196_vm3 = vcmask 1045504   ;;  %s728_s1 = inlined_call_operand.vmem [shape: f32[3,3,128], index: 1, kind: input, shape index: {}]   ;;  %s729_s0 = inlined_call_operand.vmem [shape: f32[2,16,3], index: 0, kind: input, shape index: {}]   ;;  %s730_s2 = inlined_call_operand.vmem [shape: f32[1,128], index: 2, kind: input, shape index: {}]   ;;  %s731_s3 = inlined_call_operand.vmem [shape: f32[2,14,128], index: 3, kind: output, shape index: {}]  }
   0x1   :  { %v562_v0 = vld [vmem:[%s728_s1 + $0x4] sm:$0x7]  ;;  %v19_v1 = vld [vmem:[%s728_s1] sm:$0x7]  ;;  %v15_v3 = vld [vmem:[%s729_s0 + $0x8] sm:$0xff] }
   0x2   :  { %v14_v2 = vld [vmem:[%s729_s0] sm:$0xff]  ;;  %605 = vmatprep.subr.msk.mxu0 %vm33_vm0, %v562_v0  ;;  %610 = vmatprep.subr.msk.mxu1 %vm33_vm0, %v19_v1  ;;  %v569_v5 = vld [vmem:[%s728_s1 + $0x8] sm:$0x7]  ;;  %v26_v7 = vrot.slane %v15_v3, 1  ;;  %v198_v9 = vrot.slane %v15_v3, 2  ;;  %v16_v10 = vld [vmem:[%s729_s0 + $0x10] sm:$0xff] }
   0x3   :  { %v25_v4 = vrot.slane %v14_v2, 1  ;;  %v574_v6 = vld [vmem:[%s728_s1 + $0x4] sm:$0x7]  ;;  %606 = vmatpush3.msk.msra.mxu0 %vm33_vm0, %v562_v0  ;;  %611 = vmatpush3.msk.msra.mxu1 %vm33_vm0, %v19_v1  ;;  %v197_v8 = vrot.slane %v14_v2, 2  ;;  %v17_v11 = vld [vmem:[%s729_s0 + $0x18] sm:$0xff]  ;;  %v298_v12 = vrot.slane %v16_v10, 1 }
   0x4   :  { %612 = vmatprep.mubr.msk.f32.mxu1 %vm28_vm2, %v14_v2  ;;  %615 = vmatprep.subr.msk.mxu0 %vm33_vm0, %v569_v5  ;;  %v299_v13 = vrot.slane %v17_v11, 1  ;;  %v466_v16 = vrot.slane %v16_v10, 2  ;;  %v467_v17 = vrot.slane %v17_v11, 2  ;;  %v294_v19 = vld [vmem:[%s728_s1] sm:$0x7] }
   0x5   :  { %v27_v14 = vsel %vm24_vm1, %v25_v4, %v26_v7  ;;  %613 = vmatmul.mubr.msk.f32.vlgmr.msra.gmra.mxu1 %vm28_vm2, %v15_v3  ;;  %620 = vmatprep.subr.msk.mxu1 %vm33_vm0, %v574_v6  ;;  %v199_v15 = vsel %vm196_vm3, %v197_v8, %v198_v9  ;;  %v581_v20 = vld [vmem:[%s728_s1 + $0x8] sm:$0x7]  ;;  %v573_v28 = vld [vmem:[%s730_s2] ss:$0 sm:$0xff] }
   0x6   :  { %607 = vmatprep.mubr.msk.f32.mxu0 %vm28_vm2, %v27_v14  ;;  %621 = vmatpush3.msk.msra.mxu1 %vm33_vm0, %v574_v6  ;;  %v300_v18 = vsel %vm24_vm1, %v298_v12, %v299_v13  ;;  %v468_v21 = vsel %vm196_vm3, %v466_v16, %v467_v17 }
   0x7   :  { %608 = vmatmul.mubr.msk.f32.vlgmr.msra.gmra.mxu0 %vm28_vm2, %v26_v7  ;;  %622 = vmatprep.mubr.msk.f32.mxu1 %vm28_vm2, %v300_v18 }
   0x8   :  { %616 = vmatpush3.msk.msra.mxu0 %vm33_vm0, %v569_v5  ;;  %617 = vmatprep.mubr.msk.f32.mxu0 %vm28_vm2, %v199_v15 }
   0x9   :  { %625 = vmatprep.subr.msk.mxu0 %vm33_vm0, %v294_v19  ;;  %623 = vmatmul.mubr.msk.f32.vlgmr.msra.gmra.mxu1 %vm28_vm2, %v299_v13 }
   0xa   :  { %630 = vmatprep.subr.msk.mxu1 %vm33_vm0, %v581_v20  ;;  %632 = vmatprep.mubr.msk.f32.mxu1 %vm28_vm2, %v468_v21 }
   0xb   :  { %618 = vmatmul.mubr.msk.f32.vlgmr.msra.gmra.mxu0 %vm28_vm2, %v198_v9  ;;  %631 = vmatpush3.msk.msra.mxu1 %vm33_vm0, %v581_v20 }
   0xc   :  { %626 = vmatpush3.msk.msra.mxu0 %vm33_vm0, %v294_v19  ;;  %627 = vmatprep.mubr.msk.f32.mxu0 %vm28_vm2, %v16_v10 }
   0xd   :  { %633 = vmatmul.mubr.msk.f32.vlgmr.msra.gmra.mxu1 %vm28_vm2, %v467_v17 }
   0xf   :  { %628 = vmatmul.mubr.msk.f32.vlgmr.msra.gmra.mxu0 %vm28_vm2, %v17_v11 }
  0xc5   :  { %v614_v22 = vpop.f32.mrf.mxu1 }
  0xc7   :  { %v609_v23 = vpop.f32.mrf.mxu0  ;;  %v185_v24 = vpop.f32.mrf.mxu1 }
  0xc8   :  { %v191_v27 = vadd.f32 %v614_v22, %v609_v23 }
  0xc9   :  { %v103_v25 = vpop.f32.mrf.mxu0  ;;  %v624_v26 = vpop.f32.mrf.mxu1 }
  0xca   :  { %v186_v31 = vadd.f32 %v185_v24, %v103_v25 }
  0xcb   :  { %v619_v29 = vpop.f32.mrf.mxu0  ;;  %v374_v30 = vpop.f32.mrf.mxu1 }
  0xcc   :  { %v283_v32 = vadd.f32 %v619_v29, %v191_v27 }
  0xcd   :  { %v273_v33 = vpop.f32.mrf.mxu0  ;;  %v634_v37 = vpop.f32.mrf.mxu1 }
  0xce   :  { %v291_v34 = vadd.f32 %v573_v28, %v283_v32  ;;  %v282_v35 = vadd.f32 %v273_v33, %v186_v31 }
  0xcf   :  { %v629_v36 = vpop.f32.mrf.mxu0  ;;  %v542_v43 = vpop.f32.mrf.mxu1 }
  0xd0   :  { %293 = vst [vmem:[%s731_s3 + $0x8] sm:$0x3f] %v291_v34  ;;  %v290_v38 = vadd.f32 %v573_v28, %v282_v35  ;;  %v462_v39 = vadd.f32 %v629_v36, %v624_v26 }
  0xd1   :  { %v456_v40 = vpop.f32.mrf.mxu0 }
  0xd2   :  { %292 = vst [vmem:[%s731_s3] sm:$0xff] %v290_v38  ;;  %v552_v41 = vadd.f32 %v634_v37, %v462_v39  ;;  %v457_v42 = vadd.f32 %v456_v40, %v374_v30 }
  0xd4   :  { %v554_v44 = vadd.f32 %v573_v28, %v552_v41  ;;  %v551_v45 = vadd.f32 %v542_v43, %v457_v42 }
  0xd6   :  { %586 = vst [vmem:[%s731_s3 + $0x18] sm:$0x3f] %v554_v44  ;;  %v553_v46 = vadd.f32 %v573_v28, %v551_v45 }
  0xd8   :  { %585 = vst [vmem:[%s731_s3 + $0x10] sm:$0xff] %v553_v46 }

</bundles_post_ra>
